<compile_context>
chip_gen: v7x
topology: tpu7x:2x2x1
jax: 0.10.0
libtpu: 0.0.40
codegen_flags: <defaults>
</compile_context>

<pallas_src>
import functools

import jax
import jax.numpy as jnp
from jax.experimental import pallas as pl
from jax.experimental.pallas import tpu as pltpu

LANE = 128
SUBLANE_F32 = 8


def _round_up(n, m):
    return ((n + m - 1) // m) * m


def mlp_kernel(x_ref, w1_ref, b1_ref, w2_ref, b2_ref, o_ref):
    x = x_ref[...]
    w1 = w1_ref[...]
    # In-register cast to the weight dtype (bf16 MXU path); x's HBM stream stays
    # at its native width, only vregs are narrowed here.
    if x.dtype != w1.dtype:
        x = x.astype(w1.dtype)
    # fc1: [TB, in] @ [in, hid] with f32 accumulation on the MXU.
    h = jnp.dot(x, w1, preferred_element_type=jnp.float32)
    # Bias add (VPU) + tanh (EUP) in f32 (also correct on v5e, no bf16 VPU).
    h = jnp.tanh(h + b1_ref[...])
    w2 = w2_ref[...]
    if w2.dtype != jnp.float32:
        h = h.astype(w2.dtype)
    # fc2: [TB, hid] @ [hid, cls] with f32 accumulation.
    out = jnp.dot(h, w2, preferred_element_type=jnp.float32) + b2_ref[...]
    o_ref[...] = out.astype(o_ref.dtype)


def prepare_params(w1, b1, w2, b2, param_dtype=jnp.bfloat16):
    """One-time (model-init) parameter packaging.

    Casts the matmul weights to the MXU compute dtype (bf16 by default for
    v6e/v7x; pass jnp.float32 for the exact-f32 path) and keeps biases in f32
    for the f32 epilogue.  No padding is materialized: all feature dims ride as
    full-dim blocks in the kernel.
    """
    w1 = jnp.asarray(w1, param_dtype)
    w2 = jnp.asarray(w2, param_dtype)
    b1 = jnp.asarray(b1, jnp.float32).reshape(1, -1)
    b2 = jnp.asarray(b2, jnp.float32).reshape(1, -1)
    return w1, b1, w2, b2


@functools.partial(jax.jit, static_argnames=("block_b",))
def classifier_forward(x, w1, b1, w2, b2, *, block_b=1024):
    """out = tanh(x @ w1 + b1) @ w2 + b2  (PyTorch fc1 -> tanh -> fc2)."""
    B, in_features = x.shape
    hidden = w1.shape[1]
    num_classes = w2.shape[1]
    assert w1.shape[0] == in_features and w2.shape[0] == hidden

    # Dtype-aware sublane rounding of the batch tile: 8 rows for f32 x,
    # 16 for bf16 x (32 for int8/fp8).
    sub = max(SUBLANE_F32, 32 // jnp.dtype(x.dtype).itemsize)

    # Batch tiling: cap the tile at block_b, balance tiles across grid steps
    # (avoids a near-empty remainder tile), and keep the grid even when >1 so
    # v7x's two TensorCores both get work (no-op on v5e/v6e).
    b_rounded = _round_up(B, sub)
    tb_cap = _round_up(min(block_b, b_rounded), sub)
    grid_b = pl.cdiv(b_rounded, tb_cap)
    if grid_b > 1:
        grid_b = _round_up(grid_b, 2)
    tb = _round_up(pl.cdiv(b_rounded, grid_b), sub)
    b_p = grid_b * tb

    # Only batch rows are ever padded (and only when B is not a tile multiple).
    x_p = x if b_p == B else jnp.pad(x, ((0, b_p - B), (0, 0)))

    # Biases in f32, shaped (1, n).  No-ops if prepare_params was used.
    b1 = jnp.asarray(b1, jnp.float32).reshape(1, hidden)
    b2 = jnp.asarray(b2, jnp.float32).reshape(1, num_classes)

    # Constant index_map -> same block every grid step -> stays VMEM-resident
    # (no re-DMA of weights/biases across batch tiles).
    resident = lambda a: pl.BlockSpec(a.shape, lambda i: (0,) * a.ndim)

    out_p = pl.pallas_call(
        mlp_kernel,
        out_shape=jax.ShapeDtypeStruct((b_p, num_classes), x.dtype),
        grid=(grid_b,),
        in_specs=[
            # x tiled over batch rows; last dim = full array dim (no lane pad).
            pl.BlockSpec((tb, in_features), lambda i: (i, 0)),
            resident(w1),
            resident(b1),
            resident(w2),
            resident(b2),
        ],
        # Output written at its real class width (full-dim last block): ~8x less
        # HBM write traffic than a 128-padded slab + post-slice.
        out_specs=pl.BlockSpec((tb, num_classes), lambda i: (i, 0)),
        compiler_params=pltpu.CompilerParams(
            dimension_semantics=("parallel",),  # batch axis -> megacore sharding
        ),
    )(x_p, w1, b1, w2, b2)

    # Slice away batch-row padding only (no class-dim slice needed anymore).
    return out_p if b_p == B else out_p[:B]


def reference_forward(x, w1, b1, w2, b2):
    return jnp.tanh(x @ w1 + b1) @ w2 + b2


if __name__ == "__main__":
    # Module-consistent toy shapes: batch=8, input_size=32, hidden=32, classes=16.
    B, input_size, hidden_size1, num_classes = 8, 32, 32, 16

    key = jax.random.PRNGKey(0)
    kx, k1, kb1, k2, kb2 = jax.random.split(key, 5)

    x = jax.random.normal(kx, (B, input_size), dtype=jnp.float32)
    # Deterministic "nn.Linear-like" init (uniform in +-1/sqrt(fan_in)).
    lim1 = 1.0 / jnp.sqrt(jnp.float32(input_size))
    lim2 = 1.0 / jnp.sqrt(jnp.float32(hidden_size1))
    w1 = jax.random.uniform(k1, (input_size, hidden_size1), jnp.float32, -lim1, lim1)
    b1 = jax.random.uniform(kb1, (1, hidden_size1), jnp.float32, -lim1, lim1)
    w2 = jax.random.uniform(k2, (hidden_size1, num_classes), jnp.float32, -lim2, lim2)
    b2 = jax.random.uniform(kb2, (1, num_classes), jnp.float32, -lim2, lim2)

    # Params prepared ONCE (init-time), not per forward call.
    params_f32 = prepare_params(w1, b1, w2, b2, param_dtype=jnp.float32)
    params_bf16 = prepare_params(w1, b1, w2, b2, param_dtype=jnp.bfloat16)

    # 1) Small-batch exact f32 path (single grid step).
    ref = reference_forward(x, w1, b1, w2, b2)
    out = classifier_forward(x, *params_f32)
    jax.block_until_ready(out)
    assert out.shape == (B, num_classes)
    assert jnp.allclose(out, ref, atol=1e-5, rtol=1e-5)

    # 2) Multi-tile grid path: batch not a multiple of the tile (row padding +
    #    balanced, even grid).
    B2 = 300
    x2 = jax.random.normal(jax.random.PRNGKey(1), (B2, input_size), jnp.float32)
    ref2 = reference_forward(x2, w1, b1, w2, b2)
    out2 = classifier_forward(x2, *params_f32, block_b=128)
    jax.block_until_ready(out2)
    assert out2.shape == (B2, num_classes)
    assert jnp.allclose(out2, ref2, atol=1e-5, rtol=1e-5)

    # 3) bf16 MXU path (default param dtype for v6e/v7x): bf16 weights,
    #    in-kernel x cast, f32 accumulation & f32 bias/tanh epilogue.
    out2_bf16 = classifier_forward(x2, *params_bf16, block_b=128)
    jax.block_until_ready(out2_bf16)
    assert out2_bf16.shape == (B2, num_classes)
    assert jnp.allclose(out2_bf16, ref2, atol=5e-2, rtol=5e-2)

    # 4) Default big-tile config (block_b=1024) on the same data.
    out2_big = classifier_forward(x2, *params_bf16)
    jax.block_until_ready(out2_big)
    assert jnp.allclose(out2_big, ref2, atol=5e-2, rtol=5e-2)

    # TODO(synk): the args.linear branch (single fc1, no tanh/fc2) is a degenerate
    # case of this kernel and is not implemented separately here.
    print("KERNEL_OK")
</pallas_src>

<mosaic_0001>
module attributes {stable_mosaic.version = 11 : i64} {
  func.func @mlp_kernel(%arg0: i32, %arg1: memref<8x32xf32, #tpu.memory_space<vmem>>, %arg2: memref<32x32xf32, #tpu.memory_space<vmem>>, %arg3: memref<1x32xf32, #tpu.memory_space<vmem>>, %arg4: memref<32x16xf32, #tpu.memory_space<vmem>>, %arg5: memref<1x16xf32, #tpu.memory_space<vmem>>, %arg6: memref<8x16xf32, #tpu.memory_space<vmem>>) attributes {dimension_semantics = [#tpu.dimension_semantics<parallel>], iteration_bounds = array<i64: 1>, scalar_prefetch = 0 : i64, scratch_operands = 0 : i64, tpu.core_type = #tpu.core_type<tc>, window_params = [{transform_indices = @transform_0, window_bounds = array<i64: 8, 32>}, {pipeline_mode = #tpu.pipeline_mode<synchronous>, transform_indices = @transform_1, window_bounds = array<i64: 32, 32>}, {pipeline_mode = #tpu.pipeline_mode<synchronous>, transform_indices = @transform_2, window_bounds = array<i64: 1, 32>}, {pipeline_mode = #tpu.pipeline_mode<synchronous>, transform_indices = @transform_3, window_bounds = array<i64: 32, 16>}, {pipeline_mode = #tpu.pipeline_mode<synchronous>, transform_indices = @transform_4, window_bounds = array<i64: 1, 16>}, {transform_indices = @transform_5, window_bounds = array<i64: 8, 16>}]} {
    %c0 = arith.constant 0 : index
    %c0_0 = arith.constant 0 : index
    %0 = vector.load %arg1[%c0, %c0_0] : memref<8x32xf32, #tpu.memory_space<vmem>>, vector<8x32xf32>
    %c0_1 = arith.constant 0 : index
    %c0_2 = arith.constant 0 : index
    %1 = vector.load %arg2[%c0_1, %c0_2] : memref<32x32xf32, #tpu.memory_space<vmem>>, vector<32x32xf32>
    %cst = arith.constant dense<0.000000e+00> : vector<8x32xf32>
    %2 = tpu.matmul %0, %1, %cst {dimension_numbers = #tpu.dot_dimension_numbers<[1], [0], [0], [1], [0, 0, 1, 1], [], []>} : vector<8x32xf32>, vector<32x32xf32>, vector<8x32xf32> -> vector<8x32xf32>
    %c0_3 = arith.constant 0 : index
    %c0_4 = arith.constant 0 : index
    %3 = vector.load %arg3[%c0_3, %c0_4] : memref<1x32xf32, #tpu.memory_space<vmem>>, vector<1x32xf32>
    %4 = vector.broadcast %3 : vector<1x32xf32> to vector<8x32xf32>
    %5 = arith.addf %2, %4 : vector<8x32xf32>
    %6 = math.tanh %5 : vector<8x32xf32>
    %c0_5 = arith.constant 0 : index
    %c0_6 = arith.constant 0 : index
    %7 = vector.load %arg4[%c0_5, %c0_6] : memref<32x16xf32, #tpu.memory_space<vmem>>, vector<32x16xf32>
    %cst_7 = arith.constant dense<0.000000e+00> : vector<8x16xf32>
    %8 = tpu.matmul %6, %7, %cst_7 {dimension_numbers = #tpu.dot_dimension_numbers<[1], [0], [0], [1], [0, 0, 1, 1], [], []>} : vector<8x32xf32>, vector<32x16xf32>, vector<8x16xf32> -> vector<8x16xf32>
    %c0_8 = arith.constant 0 : index
    %c0_9 = arith.constant 0 : index
    %9 = vector.load %arg5[%c0_8, %c0_9] : memref<1x16xf32, #tpu.memory_space<vmem>>, vector<1x16xf32>
    %10 = vector.broadcast %9 : vector<1x16xf32> to vector<8x16xf32>
    %11 = arith.addf %8, %10 : vector<8x16xf32>
    %c0_10 = arith.constant 0 : index
    %c0_11 = arith.constant 0 : index
    %12 = vector.load %arg6[%c0_10, %c0_11] : memref<8x16xf32, #tpu.memory_space<vmem>>, vector<8x16xf32>
    tpu.vector_store %arg6[%c0_10, %c0_11], %11 {strides = array<i32>} : memref<8x16xf32, #tpu.memory_space<vmem>>, vector<8x16xf32>,
    return
  }
  func.func @transform_0(%arg0: i32) -> (i32, i32) {
    %c0_i32 = arith.constant 0 : i32
    %c0_i32_0 = arith.constant 0 : i32
    return %arg0, %c0_i32 : i32, i32
  }
  func.func @transform_1(%arg0: i32) -> (i32, i32) {
    %c0_i32 = arith.constant 0 : i32
    %c0_i32_0 = arith.constant 0 : i32
    %c0_i32_1 = arith.constant 0 : i32
    return %c0_i32, %c0_i32_0 : i32, i32
  }
  func.func @transform_2(%arg0: i32) -> (i32, i32) {
    %c0_i32 = arith.constant 0 : i32
    %c0_i32_0 = arith.constant 0 : i32
    %c0_i32_1 = arith.constant 0 : i32
    return %c0_i32, %c0_i32_0 : i32, i32
  }
  func.func @transform_3(%arg0: i32) -> (i32, i32) {
    %c0_i32 = arith.constant 0 : i32
    %c0_i32_0 = arith.constant 0 : i32
    %c0_i32_1 = arith.constant 0 : i32
    return %c0_i32, %c0_i32_0 : i32, i32
  }
  func.func @transform_4(%arg0: i32) -> (i32, i32) {
    %c0_i32 = arith.constant 0 : i32
    %c0_i32_0 = arith.constant 0 : i32
    %c0_i32_1 = arith.constant 0 : i32
    return %c0_i32, %c0_i32_0 : i32, i32
  }
  func.func @transform_5(%arg0: i32) -> (i32, i32) {
    %c0_i32 = arith.constant 0 : i32
    %c0_i32_0 = arith.constant 0 : i32
    return %arg0, %c0_i32 : i32, i32
  }
}

</mosaic_0001>

<bundles_post_ra>
// kernel: classifier_forward.1
= control target key start
LH: loop header
LB: loop body
LE: loop exit
PB: predicated region body
PF: predicated region fallthrough
CT: control target
= control target key end

     0   :  { %v286_v3 = vmov 0.0|0.0   ;;  %vm287_vm0 = vmmov 0   ;;  %v288_v6 = vmov 0.0   ;;  %s367_s0 = inlined_call_operand.vmem [shape: f32[8,32], index: 0, kind: input, shape index: {}]   ;;  %s368_s1 = inlined_call_operand.vmem [shape: f32[32,32], index: 1, kind: input, shape index: {}]   ;;  %s369_s2 = inlined_call_operand.vmem [shape: f32[1,32], index: 2, kind: input, shape index: {}]   ;;  %s370_s3 = inlined_call_operand.vmem [shape: f32[32,16], index: 3, kind: input, shape index: {}]   ;;  %s371_s4 = inlined_call_operand.vmem [shape: f32[1,16], index: 4, kind: input, shape index: {}]   ;;  %s372_s5 = inlined_call_operand.hbm [shape: f32[8,16], index: 5, kind: output, shape index: {}]  }
   0x1   :  { %v22_v0 = vld [vmem:[%s368_s1] sm:$0xff]  ;;  %v23_v1 = vld [vmem:[%s368_s1 + $0x8] sm:$0xff]  ;;  %v24_v2 = vld [vmem:[%s368_s1 + $0x10] sm:$0xff]  ;;  %244 = vmatprep.subr.bf16.mxu0 %v286_v3  ;;  %230 = vmatprep.mubr.msk.f32.mxu0 %vm287_vm0, %v288_v6 }
   0x2   :  { %v245_v4 = vpack.c.bf16 %v23_v1, %v22_v0  ;;  %v25_v5 = vld [vmem:[%s368_s1 + $0x18] sm:$0xff]  ;;  %250 = vmatprep.subr.bf16.mxu1 %v286_v3  ;;  %241 = vmatprep.mubr.msk.f32.mxu1 %vm287_vm0, %v288_v6 }
   0x3   :  { %10 = vsyncpa [#allocation3], 0  ;;  %v248_v7 = vpack.c.bf16 %v25_v5, %v24_v2  ;;  %v21_v8 = vld [vmem:[%s367_s0] sm:$0xff]  ;;  %vm33_vm1 = vcmask 261120   ;;  %v109_v10 = vld [vmem:[%s370_s3 + $0x8] sm:$0xff]  ;;  %vm192_vm2 = vcmask 130048  }
   0x4   :  { %246 = vmatpush3.bf16.msra.mxu0 %v245_v4  ;;  %v108_v9 = vld [vmem:[%s370_s3] sm:$0xff]  ;;  %v110_v11 = vld [vmem:[%s370_s3 + $0x10] sm:$0xff]  ;;  %v111_v13 = vld [vmem:[%s370_s3 + $0x18] sm:$0xff]  ;;  %s289_s3 = smov [#allocation2]  }
   0x5   :  { %247 = vmatprep.subr.bf16.mxu0 %v286_v3  ;;  %v251_v12 = vpack.c.bf16 %v109_v10, %v108_v9  ;;  %v254_v14 = vpack.c.bf16 %v111_v13, %v110_v11  ;;  %v208_v15 = vld [vmem:[%s369_s2] ss:$0 sm:$0xff]  ;;  %s200_s13 = sshll.u32 %s289_s3, 4  ;;  %s201_s13 = int_to_ptr.vmem [resolvable:$true] %s200_s13 }
   0x6   :  { %v210_v20 = vld [vmem:[%s371_s4] ss:$0 sm:$0xff]  ;;  %s262_s2 = scalar_lea.vmem %s201_s13, 128  ;;  %p267_p1 = scmp.lt.s32.totalorder %s201_s13, %s201_s13 }
   0x7   :  { %252 = vmatpush3.bf16.msra.mxu1 %v251_v12  ;;  %p263_p0 = scmp.ne.s32.totalorder %s201_s13, %s262_s2  ;;  %p268_p2 = scmp.lt.s32.totalorder %s262_s2, %s262_s2 }
   0x8   :  { %249 = vmatpush3.bf16.msra.mxu0 %v248_v7  ;;  %253 = vmatprep.subr.bf16.mxu1 %v286_v3 }
   0x9   :  { %p269_p3 = por %p268_p2, %p267_p1 }
   0xb   :  { %231 = vmatmul.mubr.msk.f32.vlgmr.msra.gmra.mrb[0].mxu0 %vm33_vm1, %v21_v8  ;;  %255 = vmatpush3.bf16.msra.mxu1 %v254_v14  ;;  %p270_p4 = pnand %p269_p3, %p263_p0 }
  0xde   :  { %v103_v16 = vpop.f32.mrb[0].mxu0 }
  0xdf   :  { %v104_v17 = vadd.f32 %v208_v15, %v103_v16  ;;  %v232_v18 = vpop.f32.mrb[1].mxu0 }
  0xe1   :  { %260 = vtanh.f32 %v104_v17 }
  0xeb   :  { %v261_v19 = vpop.eup %260 }
  0xec   :  { %242 = vmatmul.mubr.msk.f32.vlgmr.msra.gmra.mrb[0].mxu1 %vm33_vm1, %v261_v19 }
 0x1bf   :  { %v188_v21 = vpop.f32.mrb[0].mxu1 }
 0x1c0   :  { %v189_v22 = vadd.f32 %v210_v20, %v188_v21  ;;  %v243_v23 = vpop.f32.mrb[1].mxu1 }
 0x1c2   :  { %193 = vst.msk [vmem:[#allocation2] sm:$0xff] %vm192_vm2, %v189_v22 }
 0x1c3   :  { %273 = shalt.err (!%p270_p4)
}
 0x1c4   :  { %s274_s16 = scalar_lea.hbm %s372_s5, 128 }
 0x1c5   :  { %p275_p5 = scmp.ne.s32.totalorder %s372_s5, %s274_s16  ;;  %p278_p6 = scmp.lt.u32.totalorder %s274_s16, %s372_s5 }
 0x1c7   :  { %p280_p7 = pnand %p278_p6, %p275_p5 }
 0x1c9   :  { %283 = shalt.err (!%p280_p7)
}
 0x1ca   :  { %203 = dma.vmem_to_hbm [thread:$0]  %s201_s13, 128, %s372_s5, [#allocation3]  }
 0x1cb   :  { %284 = dma.done.wait [#allocation3], 128  }
 0x1cc   :  { %285 = vsyncadd [#allocation3], 4294967168 }
 0x1cd   :  { %207 = vsyncpa [#allocation3], 1 }

</bundles_post_ra>
